<compile_context>
chip_gen: v5e
topology: v5e:2x2
jax: 0.10.0
libtpu: 0.0.40
codegen_flags: <defaults>
</compile_context>

<pallas_src>
import functools

import jax
import jax.numpy as jnp
from jax.experimental import pallas as pl
from jax.experimental.pallas import tpu as pltpu

# ---------------- model hyper-parameters (mirror the argparse.Namespace) ----------------
SIGNAL_WINDOW_SIZE = 16
MF_TIME_SLICE_INTERVAL = 2
MF_MAXPOOL_SIZE = 2
SUBWINDOW_SIZE = 4             # power of 2, <= time_points
DCT_NBINS = 2
DCT_NUM_FILTERS = 8
MF_NEGATIVE_SLOPE = 0.02
MF_DROPOUT_RATE = 0.1          # Dropout3d -> identity in eval mode

TIME_POINTS = SIGNAL_WINDOW_SIZE // MF_TIME_SLICE_INTERVAL       # 8
SUBWINDOW_NBINS = TIME_POINTS // SUBWINDOW_SIZE                  # 2
NDCT = SUBWINDOW_SIZE // DCT_NBINS                               # 2 (== nfreqs)
POOLED_HW = 8 // MF_MAXPOOL_SIZE                                 # 4
K_FLAT = NDCT * POOLED_HW * POOLED_HW                            # 32 (per-bin flat)
K_SUBWIN = SUBWINDOW_SIZE * POOLED_HW * POOLED_HW                # 64 (per-subwindow flat)
K_FULL = TIME_POINTS * POOLED_HW * POOLED_HW                     # 128 (full pooled flat)
F_TOTAL = SUBWINDOW_NBINS * DCT_NUM_FILTERS                      # 16


def _round_up(a, b):
    return ((a + b - 1) // b) * b


def dct2_matrix(n):
    """torch_dct.dct (norm=None):  X[k] = 2 * sum_m x[m] * cos(pi*(2m+1)*k/(2n))."""
    k = jnp.arange(n, dtype=jnp.float32)[:, None]
    m = jnp.arange(n, dtype=jnp.float32)[None, :]
    return 2.0 * jnp.cos(jnp.pi * (2.0 * m + 1.0) * k / (2.0 * n))


# ------------------------------------ Pallas kernel -------------------------------------
def _dct_feature_kernel(x_ref, w_ref, b_ref, o_ref, *, negative_slope):
    # x_ref: (tile_n, 128) pooled activations, lane-dense.
    # w_ref: (128, 16) fused DCT+mean+Conv3d weight (VMEM-resident).
    # b_ref: (1, 16) bias.
    z = jnp.dot(x_ref[...], w_ref[...], preferred_element_type=jnp.float32)
    z = z + b_ref[...]
    # Dropout3d is identity in eval mode; LeakyReLU elementwise.
    o_ref[...] = jnp.where(z >= 0, z, negative_slope * z).astype(o_ref.dtype)


# ------------------------------- fused weight construction -------------------------------
def _build_fused_weight(conv_w, conv_b):
    """conv_w: (SW, F, NDCT, H, W), conv_b: (SW, F)  ->  (128, 16) weight, (1, 16) bias.

    For each subwindow s:  z[:, s*F:(s+1)*F] = x_sw_flat @ (dct_op.T @ W_s.T) / B  + b_s,
    replicated across the DCT bins (the bin-mean averages identical linear maps).
    """
    d_t = dct2_matrix(NDCT)
    d_h = dct2_matrix(POOLED_HW)
    d_w = dct2_matrix(POOLED_HW)
    dct_op = jnp.kron(d_t, jnp.kron(d_h, d_w))            # (32, 32), t-major w-fastest flatten

    w_full = jnp.zeros((K_FULL, F_TOTAL), dtype=jnp.float32)
    for s in range(SUBWINDOW_NBINS):
        wf = conv_w[s].reshape(DCT_NUM_FILTERS, K_FLAT)   # (F, 32)
        w_bin = jnp.dot(dct_op.T, wf.T) / DCT_NBINS       # (32, F)   DCT + 1/B folded into conv
        w_sub = jnp.tile(w_bin, (DCT_NBINS, 1))           # (64, F)   same map for every bin
        w_full = w_full.at[s * K_SUBWIN:(s + 1) * K_SUBWIN,
                           s * DCT_NUM_FILTERS:(s + 1) * DCT_NUM_FILTERS].set(w_sub)
    b_full = conv_b.reshape(1, F_TOTAL).astype(jnp.float32)
    return w_full, b_full


# -------------------------------------- wrapper ------------------------------------------
def dct_feature_forward(x, conv_w, conv_b, *, tile_n=512):
    """x: (N, 1, signal_window_size, 8, 8) float32 (NCDHW).
       conv_w: (SW, F, NDCT, H, W), conv_b: (SW, F).
       returns (N, SW*F) == torch.flatten(relu(dropout(dct_features)), 1)."""
    n = x.shape[0]

    # --- glue: time-slice stride + spatial max-pool (MaxPool3d kernel [1, mp, mp]) ---
    xp = x[:, 0, ::MF_TIME_SLICE_INTERVAL]                                   # (N, T, 8, 8)
    if MF_MAXPOOL_SIZE > 1:
        mp = MF_MAXPOOL_SIZE
        xp = xp.reshape(n, TIME_POINTS, POOLED_HW, mp, POOLED_HW, mp).max(axis=(3, 5))
    # contiguous flatten -> (N, 128): no HBM transpose, kernel input is lane-dense.
    x_flat = xp.reshape(n, K_FULL)

    # --- glue: fold DCT-3D + bin-mean + Conv3d into one (128, 16) affine map ---
    w_full, b_full = _build_fused_weight(conv_w, conv_b)

    # --- batch tiling (multiple of 8 sublanes; pad so every tile is full) ---
    tn = max(8, (min(tile_n, _round_up(n, 8)) // 8) * 8)
    n_pad = _round_up(n, tn)
    if n_pad != n:
        x_flat = jnp.pad(x_flat, ((0, n_pad - n), (0, 0)))

    out = pl.pallas_call(
        functools.partial(_dct_feature_kernel, negative_slope=MF_NEGATIVE_SLOPE),
        out_shape=jax.ShapeDtypeStruct((n_pad, F_TOTAL), jnp.float32),
        grid_spec=pltpu.PrefetchScalarGridSpec(
            num_scalar_prefetch=0,
            grid=(n_pad // tn,),
            in_specs=[
                pl.BlockSpec((tn, K_FULL), lambda i: (i, 0)),
                pl.BlockSpec((K_FULL, F_TOTAL), lambda i: (0, 0)),   # VMEM-resident weight
                pl.BlockSpec((1, F_TOTAL), lambda i: (0, 0)),        # VMEM-resident bias
            ],
            out_specs=pl.BlockSpec((tn, F_TOTAL), lambda i: (i, 0)),
        ),
        compiler_params=pltpu.CompilerParams(dimension_semantics=("parallel",)),
    )(x_flat, w_full, b_full)

    return out[:n]


# ---------------------------- pure-JAX reference (sanity check) ---------------------------
def _dct_along_axis(x, axis):
    c = dct2_matrix(x.shape[axis])
    y = jnp.tensordot(x, c, axes=[[axis], [1]])
    return jnp.moveaxis(y, -1, axis)


def reference_forward(x, conv_w, conv_b):
    n = x.shape[0]
    xp = x[:, :, ::MF_TIME_SLICE_INTERVAL]
    if MF_MAXPOOL_SIZE > 1:
        mp = MF_MAXPOOL_SIZE
        xp = xp.reshape(n, 1, TIME_POINTS, POOLED_HW, mp, POOLED_HW, mp).max(axis=(4, 6))
    xp = xp[:, 0]                                                            # (N, T, H, W)
    feats = []
    for s in range(SUBWINDOW_NBINS):
        xs = xp[:, s * SUBWINDOW_SIZE:(s + 1) * SUBWINDOW_SIZE]              # (N, SWS, H, W)
        xb = xs.reshape(n, DCT_NBINS, NDCT, POOLED_HW, POOLED_HW)
        d = _dct_along_axis(_dct_along_axis(_dct_along_axis(xb, 2), 3), 4)   # dct_3d per bin
        dsw = d.mean(axis=1)                                                 # mean over bins
        z = jnp.einsum('nthw,fthw->nf', dsw, conv_w[s]) + conv_b[s]          # Conv3d full RF
        feats.append(z)
    out = jnp.stack(feats, axis=1).reshape(n, SUBWINDOW_NBINS * DCT_NUM_FILTERS)
    return jnp.where(out >= 0, out, MF_NEGATIVE_SLOPE * out)


if __name__ == "__main__":
    key = jax.random.PRNGKey(0)
    kx, kw, kb = jax.random.split(key, 3)
    x = jax.random.normal(kx, (2, 1, SIGNAL_WINDOW_SIZE, 8, 8), dtype=jnp.float32)
    conv_w = 0.1 * jax.random.normal(
        kw, (SUBWINDOW_NBINS, DCT_NUM_FILTERS, NDCT, POOLED_HW, POOLED_HW), dtype=jnp.float32)
    conv_b = 0.01 * jax.random.normal(
        kb, (SUBWINDOW_NBINS, DCT_NUM_FILTERS), dtype=jnp.float32)

    # small-batch check (single padded tile)
    out = jax.block_until_ready(jax.jit(dct_feature_forward)(x, conv_w, conv_b))
    ref = reference_forward(x, conv_w, conv_b)
    assert out.shape == (2, F_TOTAL), out.shape
    assert jnp.allclose(out, ref, rtol=1e-3, atol=1e-3), float(jnp.max(jnp.abs(out - ref)))

    # multi-tile + ragged-batch check (exercises N tiling and padding path)
    x2 = jax.random.normal(jax.random.PRNGKey(1),
                           (37, 1, SIGNAL_WINDOW_SIZE, 8, 8), dtype=jnp.float32)
    fwd_small_tiles = jax.jit(functools.partial(dct_feature_forward, tile_n=16))
    out2 = jax.block_until_ready(fwd_small_tiles(x2, conv_w, conv_b))
    ref2 = reference_forward(x2, conv_w, conv_b)
    assert out2.shape == (37, F_TOTAL), out2.shape
    assert jnp.allclose(out2, ref2, rtol=1e-3, atol=1e-3), float(jnp.max(jnp.abs(out2 - ref2)))

    print("KERNEL_OK")
</pallas_src>

<mosaic_0001>
module attributes {stable_mosaic.version = 11 : i64} {
  func.func @_dct_feature_kernel(%arg0: i32, %arg1: memref<8x128xf32, #tpu.memory_space<vmem>>, %arg2: memref<128x16xf32, #tpu.memory_space<vmem>>, %arg3: memref<1x16xf32, #tpu.memory_space<vmem>>, %arg4: memref<8x16xf32, #tpu.memory_space<vmem>>) attributes {dimension_semantics = [#tpu.dimension_semantics<parallel>], iteration_bounds = array<i64: 1>, scalar_prefetch = 0 : i64, scratch_operands = 0 : i64, tpu.core_type = #tpu.core_type<tc>, window_params = [{transform_indices = @transform_0, window_bounds = array<i64: 8, 128>}, {pipeline_mode = #tpu.pipeline_mode<synchronous>, transform_indices = @transform_1, window_bounds = array<i64: 128, 16>}, {pipeline_mode = #tpu.pipeline_mode<synchronous>, transform_indices = @transform_2, window_bounds = array<i64: 1, 16>}, {transform_indices = @transform_3, window_bounds = array<i64: 8, 16>}]} {
    %c0 = arith.constant 0 : index
    %c0_0 = arith.constant 0 : index
    %0 = vector.load %arg1[%c0, %c0_0] : memref<8x128xf32, #tpu.memory_space<vmem>>, vector<8x128xf32>
    %c0_1 = arith.constant 0 : index
    %c0_2 = arith.constant 0 : index
    %1 = vector.load %arg2[%c0_1, %c0_2] : memref<128x16xf32, #tpu.memory_space<vmem>>, vector<128x16xf32>
    %cst = arith.constant dense<0.000000e+00> : vector<8x16xf32>
    %2 = tpu.matmul %0, %1, %cst {dimension_numbers = #tpu.dot_dimension_numbers<[1], [0], [0], [1], [0, 0, 1, 1], [], []>} : vector<8x128xf32>, vector<128x16xf32>, vector<8x16xf32> -> vector<8x16xf32>
    %c0_3 = arith.constant 0 : index
    %c0_4 = arith.constant 0 : index
    %3 = vector.load %arg3[%c0_3, %c0_4] : memref<1x16xf32, #tpu.memory_space<vmem>>, vector<1x16xf32>
    %4 = vector.broadcast %3 : vector<1x16xf32> to vector<8x16xf32>
    %5 = arith.addf %2, %4 : vector<8x16xf32>
    %cst_5 = arith.constant 0.000000e+00 : f32
    %6 = vector.broadcast %cst_5 : f32 to vector<8x16xf32>
    %7 = arith.cmpf oge, %5, %6 : vector<8x16xf32>
    %cst_6 = arith.constant 2.000000e-02 : f32
    %8 = vector.broadcast %cst_6 : f32 to vector<8x16xf32>
    %9 = arith.mulf %8, %5 : vector<8x16xf32>
    %10 = arith.select %7, %5, %9 : vector<8x16xi1>, vector<8x16xf32>
    %c0_7 = arith.constant 0 : index
    %c0_8 = arith.constant 0 : index
    %11 = vector.load %arg4[%c0_7, %c0_8] : memref<8x16xf32, #tpu.memory_space<vmem>>, vector<8x16xf32>
    tpu.vector_store %arg4[%c0_7, %c0_8], %10 {strides = array<i32>} : memref<8x16xf32, #tpu.memory_space<vmem>>, vector<8x16xf32>,
    return
  }
  func.func @transform_0(%arg0: i32) -> (i32, i32) {
    %c0_i32 = arith.constant 0 : i32
    %c0_i32_0 = arith.constant 0 : i32
    return %arg0, %c0_i32 : i32, i32
  }
  func.func @transform_1(%arg0: i32) -> (i32, i32) {
    %c0_i32 = arith.constant 0 : i32
    %c0_i32_0 = arith.constant 0 : i32
    %c0_i32_1 = arith.constant 0 : i32
    return %c0_i32, %c0_i32_0 : i32, i32
  }
  func.func @transform_2(%arg0: i32) -> (i32, i32) {
    %c0_i32 = arith.constant 0 : i32
    %c0_i32_0 = arith.constant 0 : i32
    %c0_i32_1 = arith.constant 0 : i32
    return %c0_i32, %c0_i32_0 : i32, i32
  }
  func.func @transform_3(%arg0: i32) -> (i32, i32) {
    %c0_i32 = arith.constant 0 : i32
    %c0_i32_0 = arith.constant 0 : i32
    return %arg0, %c0_i32 : i32, i32
  }
}

</mosaic_0001>

<bundles_post_ra>
// kernel: dct_feature_forward.1
= control target key start
LH: loop header
LB: loop body
LE: loop exit
PB: predicated region body
PF: predicated region fallthrough
CT: control target
= control target key end

     0   :  { %vm58_vm1 = vcmask 130048   ;;  %s142_s1 = inlined_call_operand.vmem [shape: f32[128,16], index: 1, kind: input, shape index: {}]   ;;  %s143_s2 = inlined_call_operand.vmem [shape: f32[1,16], index: 2, kind: input, shape index: {}]   ;;  %s144_s0 = inlined_call_operand.vmem [shape: f32[8,128], index: 0, kind: input, shape index: {}]   ;;  %s145_s3 = inlined_call_operand.vmem [shape: f32[8,16], index: 3, kind: output, shape index: {}]  }
   0x1   :  { %v30_v0 = vld [vmem:[%s142_s1 + $0x78] sm:$0xff]  ;;  %v29_v1 = vld [vmem:[%s142_s1 + $0x70] sm:$0xff]  ;;  %v28_v2 = vld [vmem:[%s142_s1 + $0x68] sm:$0xff] }
   0x2   :  { %35 = vmatpush.msra.mxu0 %v30_v0  ;;  %v27_v3 = vld [vmem:[%s142_s1 + $0x60] sm:$0xff]  ;;  %v26_v4 = vld [vmem:[%s142_s1 + $0x58] sm:$0xff]  ;;  %v25_v5 = vld [vmem:[%s142_s1 + $0x50] sm:$0xff] }
   0x3   :  { %v24_v6 = vld [vmem:[%s142_s1 + $0x48] sm:$0xff]  ;;  %v23_v7 = vld [vmem:[%s142_s1 + $0x40] sm:$0xff]  ;;  %v22_v8 = vld [vmem:[%s142_s1 + $0x38] sm:$0xff] }
   0x4   :  { %36 = vmatpush.msra.mxu0 %v29_v1  ;;  %v21_v9 = vld [vmem:[%s142_s1 + $0x30] sm:$0xff]  ;;  %v20_v10 = vld [vmem:[%s142_s1 + $0x28] sm:$0xff]  ;;  %v19_v11 = vld [vmem:[%s142_s1 + $0x20] sm:$0xff] }
   0x5   :  { %v18_v12 = vld [vmem:[%s142_s1 + $0x18] sm:$0xff]  ;;  %v17_v13 = vld [vmem:[%s142_s1 + $0x10] sm:$0xff]  ;;  %v16_v14 = vld [vmem:[%s142_s1 + $0x8] sm:$0xff] }
   0x6   :  { %37 = vmatpush.msra.mxu0 %v28_v2  ;;  %v15_v15 = vld [vmem:[%s142_s1] sm:$0xff] }
   0x7   :  { %v14_v16 = vld [vmem:[%s144_s0] sm:$0xff] }
   0x8   :  { %38 = vmatpush.msra.mxu0 %v27_v3  ;;  %v64_v17 = vld [vmem:[%s143_s2] ss:$0 sm:$0xff] }
   0xa   :  { %39 = vmatpush.msra.mxu0 %v26_v4 }
   0xc   :  { %40 = vmatpush.msra.mxu0 %v25_v5 }
   0xe   :  { %41 = vmatpush.msra.mxu0 %v24_v6 }
  0x10   :  { %42 = vmatpush.msra.mxu0 %v23_v7 }
  0x12   :  { %43 = vmatpush.msra.mxu0 %v22_v8 }
  0x14   :  { %44 = vmatpush.msra.mxu0 %v21_v9 }
  0x16   :  { %45 = vmatpush.msra.mxu0 %v20_v10 }
  0x18   :  { %46 = vmatpush.msra.mxu0 %v19_v11 }
  0x1a   :  { %47 = vmatpush.msra.mxu0 %v18_v12 }
  0x1c   :  { %48 = vmatpush.msra.mxu0 %v17_v13 }
  0x1e   :  { %49 = vmatpush.msra.mxu0 %v16_v14 }
  0x20   :  { %50 = vmatpush.msra.mxu0 %v15_v15 }
  0x21   :  { %51 = vmatmul.f32.vlgmr.msra.gmra.mxu0 %v14_v16 }
  0x9e   :  { %v52_v18 = vpop.f32.mrf.mxu0 }
  0x9f   :  { %v53_v19 = vadd.f32 %v64_v17, %v52_v18 }
  0xa1   :  { %vm55_vm0 = vcmp.ge.f32.partialorder %v53_v19, 0.0  ;;  %v56_v20 = vmul.f32 0.02, %v53_v19 }
  0xa3   :  { %v57_v21 = vsel %vm55_vm0, %v53_v19, %v56_v20 }
  0xa4   :  { %59 = vst.msk [vmem:[%s145_s3] sm:$0xff] %vm58_vm1, %v57_v21 }

</bundles_post_ra>
